<compile_context>
chip_gen: v6e
topology: v6e:2x2x1
jax: 0.10.0
libtpu: 0.0.40
codegen_flags: <defaults>
</compile_context>

<pallas_src>
import functools

import jax
import jax.numpy as jnp
from jax import lax
from jax.experimental import pallas as pl
from jax.experimental.pallas import tpu as pltpu

LANE = 128
CR = 16                                 # rows per inner sub-chunk (bf16 tile aligned)
TARGET_BLOCK_BYTES = 4 * 1024 * 1024    # per input, per pipeline buffer


def _round_up(x, m):
    return (x + m - 1) // m * m


def _num_tensorcores():
    """Best-effort TensorCore count; default 1 (correct for v5e/v6e)."""
    try:
        info = pltpu.get_tpu_info()
    except Exception:
        return 1
    for attr in ("num_cores", "core_count", "num_tensorcores",
                 "tensorcore_count", "cores_per_chip"):
        v = getattr(info, attr, None)
        if isinstance(v, int) and v >= 1:
            return int(v)
    return 1


def _make_kernel(rows, tr, cr, steps, needs_mask):
    n_chunks = tr // cr
    unroll = n_chunks if n_chunks <= 8 else 8

    def run_chunks(pred_ref, gt_ref, rem_rows, out_ref):
        # rem_rows is None on the mask-free fast path; otherwise it is the
        # (traced) number of valid rows in this block.
        if rem_rows is not None:
            row_iota = lax.broadcasted_iota(jnp.int32, (cr, 1), 0)  # hoisted

        def chunk_body(c, carry):
            tot_acc, cnt_acc = carry
            r0 = pl.multiple_of(c * cr, cr)
            pred = pred_ref[pl.ds(r0, cr), :].astype(jnp.float32)
            gt = gt_ref[pl.ds(r0, cr), :].astype(jnp.float32)

            pos_m = gt == 1.0           # positive lanes
            either = gt <= 1.0          # pos OR neg lanes (gt>1 contributes 0)
            if rem_rows is not None:
                row_ok = row_iota < (rem_rows - r0)     # (cr, 1), scalar threshold
                pos_m = jnp.logical_and(pos_m, row_ok)
                either = jnp.logical_and(either, row_ok)

            # pos_pred[pos_pred == 0] = 1e-7 ; neg_pred[neg_pred == 1] = 1 - 1e-7
            pos_pred = jnp.where(pred == 0.0, jnp.float32(1e-7), pred)
            neg_pred = jnp.where(pred == 1.0, jnp.float32(1.0 - 1e-7), pred)

            # Single transcendental per element: masks are disjoint so one log
            # feeds both branches.  Masked-out (padding) lanes may produce NaN
            # here, but the final select on `either` discards them.
            lg = jnp.log(jnp.where(pos_m, pos_pred, 1.0 - neg_pred))

            one_m_pos = 1.0 - pos_pred
            one_m_gt = 1.0 - gt
            g2 = one_m_gt * one_m_gt
            w = jnp.where(pos_m,
                          one_m_pos * one_m_pos,                 # (1 - pos_pred)^2
                          (neg_pred * neg_pred) * (g2 * g2))      # pred^2 (1-gt)^4
            elem = jnp.where(either, lg * w, 0.0)

            # Full-vreg accumulation (pure VPU adds); reduce deferred below.
            return (tot_acc + elem, cnt_acc + pos_m.astype(jnp.float32))

        zero = jnp.zeros((cr, LANE), jnp.float32)
        tot, cnt = lax.fori_loop(0, n_chunks, chunk_body, (zero, zero),
                                 unroll=unroll)

        # One cross-sublane (XLU) reduce per grid step, lane-dense stores.
        out_ref[0:1, :] += jnp.sum(tot, axis=0, keepdims=True)
        out_ref[1:2, :] += jnp.sum(cnt, axis=0, keepdims=True)

    def kernel(pred_ref, gt_ref, out_ref):
        p = pl.program_id(0)
        j = pl.program_id(1)

        # Output slab (8,128) is resident across the "arbitrary" j axis per p.
        @pl.when(j == 0)
        def _():
            out_ref[...] = jnp.zeros_like(out_ref)

        if not needs_mask:
            run_chunks(pred_ref, gt_ref, None, out_ref)
        else:
            logical_block = p * steps + j
            rem = rows - logical_block * tr     # valid rows in this block

            @pl.when(rem >= tr)                 # common case: mask-free fast path
            def _():
                run_chunks(pred_ref, gt_ref, None, out_ref)

            @pl.when(jnp.logical_and(rem > 0, rem < tr))   # ragged tail block only
            def _():
                run_chunks(pred_ref, gt_ref, rem, out_ref)
            # rem <= 0 (overflow block from the megacore split): contributes 0.

    return kernel


def _elem_terms(pred, gt):
    """Merged pos+neg sum and positive count in plain JAX (tiny tails only)."""
    pred = pred.astype(jnp.float32)
    gt = gt.astype(jnp.float32)
    pos_m = gt == 1.0
    either = gt <= 1.0
    pos_pred = jnp.where(pred == 0.0, jnp.float32(1e-7), pred)
    neg_pred = jnp.where(pred == 1.0, jnp.float32(1.0 - 1e-7), pred)
    lg = jnp.log(jnp.where(pos_m, pos_pred, 1.0 - neg_pred))
    g2 = (1.0 - gt) * (1.0 - gt)
    w = jnp.where(pos_m, (1.0 - pos_pred) ** 2, neg_pred * neg_pred * (g2 * g2))
    total = jnp.sum(jnp.where(either, lg * w, 0.0))
    cnt = jnp.sum(pos_m.astype(jnp.float32))
    return total, cnt


@functools.partial(jax.jit, static_argnames=("loss_weight",))
def gaussian_focal_loss(pred, target, loss_weight=1.0):
    """Scalar f32 loss; semantics identical to GaussianFocalLoss.forward."""
    assert pred.shape == target.shape
    n = pred.size  # static Python int at trace time

    def as_stream(x):
        # bf16/f16 pass through unconverted (cast happens in-kernel) to halve DMA.
        if not jnp.issubdtype(x.dtype, jnp.floating):
            x = x.astype(jnp.float32)
        return jnp.ravel(x)

    pred_f = as_stream(pred)
    gt_f = as_stream(target)

    rows = n // LANE
    tail = n - rows * LANE

    total = jnp.float32(0.0)
    num_pos = jnp.float32(0.0)

    if tail:
        # <128-element tail handled in plain JAX: no full-array pad/concatenate.
        t_tot, t_cnt = _elem_terms(pred_f[rows * LANE:], gt_f[rows * LANE:])
        total = total + t_tot
        num_pos = num_pos + t_cnt

    if rows > 0:
        if tail:
            pred2 = pred_f[: rows * LANE].reshape(rows, LANE)
            gt2 = gt_f[: rows * LANE].reshape(rows, LANE)
        else:
            pred2 = pred_f.reshape(rows, LANE)
            gt2 = gt_f.reshape(rows, LANE)

        # Block sizing by bytes: 4 MiB per input per buffer (8192 rows f32,
        # 16384 rows bf16); double-buffered working set = 4 * 4 MiB = 16 MiB.
        itemsize = max(pred2.dtype.itemsize, gt2.dtype.itemsize)
        tr_max = _round_up(max(CR, TARGET_BLOCK_BYTES // (LANE * itemsize)), CR)
        tr = min(tr_max, _round_up(rows, CR))
        grid_rows = pl.cdiv(rows, tr)

        # Megacore split only when the chip actually has >1 TensorCore.
        # TODO(synk): verify on v7x whether "parallel" shards the p axis across
        # both TensorCores; if xprof shows one idle TC, switch to CORE_PARALLEL
        # or an explicit pl.core_map over pltpu.create_tensorcore_mesh.
        npar = max(1, min(_num_tensorcores(), grid_rows))
        steps = pl.cdiv(grid_rows, npar)

        needs_mask = (rows % tr != 0) or (npar * steps != grid_rows)

        if npar * steps == grid_rows:
            def in_map(p, j):
                return (p * steps + j, 0)
        else:
            def in_map(p, j):
                # Clamp so the DMA never indexes past the array; overflow blocks
                # contribute nothing (rem <= 0 branch in the kernel).
                return (jnp.minimum(p * steps + j, grid_rows - 1), 0)

        kernel = _make_kernel(rows, tr, CR, steps, needs_mask)

        # Explicit VMEM budget: 2 double-buffered inputs + generous headroom.
        block_bytes = tr * LANE * (pred2.dtype.itemsize + gt2.dtype.itemsize)
        vmem_limit = int(2 * block_bytes) + (16 << 20)

        partials = pl.pallas_call(
            kernel,
            out_shape=jax.ShapeDtypeStruct((npar * 8, LANE), jnp.float32),
            grid_spec=pltpu.PrefetchScalarGridSpec(
                num_scalar_prefetch=0,
                grid=(npar, steps),
                in_specs=[
                    pl.BlockSpec((tr, LANE), in_map),
                    pl.BlockSpec((tr, LANE), in_map),
                ],
                out_specs=pl.BlockSpec((8, LANE), lambda p, j: (p, 0)),
            ),
            compiler_params=pltpu.CompilerParams(
                dimension_semantics=("parallel", "arbitrary"),
                vmem_limit_bytes=vmem_limit,
            ),
        )(pred2, gt2)

        parts = partials.reshape(npar, 8, LANE)
        total = total + jnp.sum(parts[:, 0, :])
        num_pos = num_pos + jnp.sum(parts[:, 1, :])

    # slow_neg_loss: pos_loss == 0 whenever num_pos == 0, so one merged total
    # suffices.  Keep the select (not arithmetic masking) so the divide-by-zero
    # in the unselected branch is discarded.
    loss = jnp.where(num_pos == 0.0, -total, -total / num_pos)
    return jnp.float32(loss_weight) * loss


def _reference(pred, target, loss_weight=1.0):
    """Pure-JAX reference mirroring slow_neg_loss exactly (for validation)."""
    pred = pred.astype(jnp.float32)
    gt = target.astype(jnp.float32)
    pos_mask = gt == 1.0
    neg_mask = gt < 1.0
    pos_pred = jnp.where(pred == 0.0, 1e-7, pred)
    neg_pred = jnp.where(pred == 1.0, 1.0 - 1e-7, pred)
    pos_loss = jnp.sum(jnp.where(pos_mask, jnp.log(pos_pred) * (1 - pos_pred) ** 2, 0.0))
    neg_loss = jnp.sum(
        jnp.where(neg_mask, jnp.log(1 - neg_pred) * neg_pred ** 2 * (1 - gt) ** 4, 0.0)
    )
    num_pos = jnp.sum(pos_mask.astype(jnp.float32))
    loss = jnp.where(num_pos == 0.0, -neg_loss, -(pos_loss + neg_loss) / num_pos)
    return loss_weight * loss


if __name__ == "__main__":
    key = jax.random.PRNGKey(0)
    k_pred, k_tgt = jax.random.split(key)

    N, C, H, W = 2, 4, 16, 16  # NCHW, like the PyTorch module's conv-style inputs
    pred = jax.random.uniform(k_pred, (N, C, H, W), jnp.float32, minval=0.01, maxval=0.99)
    target = jax.random.uniform(k_tgt, (N, C, H, W), jnp.float32, minval=0.0, maxval=0.95)
    # Gaussian-heatmap-style target: a few exact peaks at 1.0
    target = target.at[:, :, 8, 8].set(1.0)
    target = target.at[:, :, 3, 12].set(1.0)

    loss = jax.block_until_ready(gaussian_focal_loss(pred, target, loss_weight=1.0))
    ref = jax.block_until_ready(_reference(pred, target, 1.0))
    assert jnp.allclose(loss, ref, rtol=1e-4, atol=1e-5), (loss, ref)

    print("KERNEL_OK")
</pallas_src>

<mosaic_0001>
module attributes {stable_mosaic.version = 11 : i64} {
  func.func @kernel(%arg0: i32, %arg1: i32, %arg2: memref<16x128xf32, #tpu.memory_space<vmem>>, %arg3: memref<16x128xf32, #tpu.memory_space<vmem>>, %arg4: memref<8x128xf32, #tpu.memory_space<vmem>>) attributes {dimension_semantics = [#tpu.dimension_semantics<parallel>, #tpu.dimension_semantics<arbitrary>], iteration_bounds = array<i64: 1, 1>, scalar_prefetch = 0 : i64, scratch_operands = 0 : i64, tpu.core_type = #tpu.core_type<tc>, window_params = [{transform_indices = @transform_0, window_bounds = array<i64: 16, 128>}, {transform_indices = @transform_1, window_bounds = array<i64: 16, 128>}, {transform_indices = @transform_2, window_bounds = array<i64: 8, 128>}]} {
    %c0_i32 = arith.constant 0 : i32
    %0 = arith.cmpi eq, %arg1, %c0_i32 : i32
    %1 = arith.extui %0 : i1 to i32
    %c0_i32_0 = arith.constant 0 : i32
    %2 = arith.cmpi ne, %1, %c0_i32_0 : i32
    scf.if %2 {
      %cst_22 = arith.constant 0.000000e+00 : f32
      %53 = vector.broadcast %cst_22 : f32 to vector<8x128xf32>
      %c0_23 = arith.constant 0 : index
      %c0_24 = arith.constant 0 : index
      %54 = vector.load %arg4[%c0_23, %c0_24] : memref<8x128xf32, #tpu.memory_space<vmem>>, vector<8x128xf32>
      tpu.vector_store %arg4[%c0_23, %c0_24], %53 {strides = array<i32>} : memref<8x128xf32, #tpu.memory_space<vmem>>, vector<8x128xf32>,
    } else {
    }
    %cst = arith.constant 0.000000e+00 : f32
    %3 = vector.broadcast %cst : f32 to vector<16x128xf32>
    %c0_i32_1 = arith.constant 0 : i32
    %c16_i32 = arith.constant 16 : i32
    %4 = arith.muli %c0_i32_1, %c16_i32 : i32
    %5 = tpu.assume_multiple %4, 16 : i32
    %6 = arith.index_cast %5 : i32 to index
    %c0 = arith.constant 0 : index
    %7 = vector.load %arg2[%6, %c0] : memref<16x128xf32, #tpu.memory_space<vmem>>, vector<16x128xf32>
    %8 = arith.index_cast %5 : i32 to index
    %c0_2 = arith.constant 0 : index
    %9 = vector.load %arg3[%8, %c0_2] : memref<16x128xf32, #tpu.memory_space<vmem>>, vector<16x128xf32>
    %cst_3 = arith.constant 1.000000e+00 : f32
    %10 = vector.broadcast %cst_3 : f32 to vector<16x128xf32>
    %11 = arith.cmpf oeq, %9, %10 : vector<16x128xf32>
    %cst_4 = arith.constant 1.000000e+00 : f32
    %12 = vector.broadcast %cst_4 : f32 to vector<16x128xf32>
    %13 = arith.cmpf ole, %9, %12 : vector<16x128xf32>
    %cst_5 = arith.constant 0.000000e+00 : f32
    %14 = vector.broadcast %cst_5 : f32 to vector<16x128xf32>
    %15 = arith.cmpf oeq, %7, %14 : vector<16x128xf32>
    %cst_6 = arith.constant 1.000000e-07 : f32
    %16 = vector.broadcast %cst_6 : f32 to vector<16x128xf32>
    %17 = arith.select %15, %16, %7 : vector<16x128xi1>, vector<16x128xf32>
    %cst_7 = arith.constant 1.000000e+00 : f32
    %18 = vector.broadcast %cst_7 : f32 to vector<16x128xf32>
    %19 = arith.cmpf oeq, %7, %18 : vector<16x128xf32>
    %cst_8 = arith.constant 0.99999988 : f32
    %20 = vector.broadcast %cst_8 : f32 to vector<16x128xf32>
    %21 = arith.select %19, %20, %7 : vector<16x128xi1>, vector<16x128xf32>
    %cst_9 = arith.constant 1.000000e+00 : f32
    %22 = vector.broadcast %cst_9 : f32 to vector<16x128xf32>
    %23 = arith.subf %22, %21 : vector<16x128xf32>
    %24 = arith.select %11, %17, %23 : vector<16x128xi1>, vector<16x128xf32>
    %25 = math.log %24 : vector<16x128xf32>
    %cst_10 = arith.constant 1.000000e+00 : f32
    %26 = vector.broadcast %cst_10 : f32 to vector<16x128xf32>
    %27 = arith.subf %26, %17 : vector<16x128xf32>
    %cst_11 = arith.constant 1.000000e+00 : f32
    %28 = vector.broadcast %cst_11 : f32 to vector<16x128xf32>
    %29 = arith.subf %28, %9 : vector<16x128xf32>
    %30 = arith.mulf %29, %29 : vector<16x128xf32>
    %31 = arith.mulf %27, %27 : vector<16x128xf32>
    %32 = arith.mulf %21, %21 : vector<16x128xf32>
    %33 = arith.mulf %30, %30 : vector<16x128xf32>
    %34 = arith.mulf %32, %33 : vector<16x128xf32>
    %35 = arith.select %11, %31, %34 : vector<16x128xi1>, vector<16x128xf32>
    %36 = arith.mulf %25, %35 : vector<16x128xf32>
    %cst_12 = arith.constant 0.000000e+00 : f32
    %37 = vector.broadcast %cst_12 : f32 to vector<16x128xf32>
    %38 = arith.select %13, %36, %37 : vector<16x128xi1>, vector<16x128xf32>
    %39 = arith.addf %3, %38 : vector<16x128xf32>
    %40 = arith.extui %11 : vector<16x128xi1> to vector<16x128xi32>
    %41 = arith.sitofp %40 : vector<16x128xi32> to vector<16x128xf32>
    %42 = arith.addf %3, %41 : vector<16x128xf32>
    %c1_i32 = arith.constant 1 : i32
    %c0_13 = arith.constant 0 : index
    %c0_14 = arith.constant 0 : index
    %43 = vector.load %arg4[%c0_13, %c0_14] : memref<8x128xf32, #tpu.memory_space<vmem>>, vector<1x128xf32>
    %cst_15 = arith.constant dense<0.000000e+00> : vector<128xf32>
    %44 = vector.multi_reduction <add>, %39, %cst_15 [0] : vector<16x128xf32> to vector<128xf32>
    %45 = vector.shape_cast %44 : vector<128xf32> to vector<1x128xf32>
    %46 = arith.addf %43, %45 : vector<1x128xf32>
    %c0_16 = arith.constant 0 : index
    %c0_17 = arith.constant 0 : index
    %47 = vector.load %arg4[%c0_16, %c0_17] : memref<8x128xf32, #tpu.memory_space<vmem>>, vector<1x128xf32>
    tpu.vector_store %arg4[%c0_16, %c0_17], %46 {strides = array<i32>} : memref<8x128xf32, #tpu.memory_space<vmem>>, vector<1x128xf32>,
    %c1 = arith.constant 1 : index
    %c0_18 = arith.constant 0 : index
    %48 = vector.load %arg4[%c1, %c0_18] : memref<8x128xf32, #tpu.memory_space<vmem>>, vector<1x128xf32>
    %cst_19 = arith.constant dense<0.000000e+00> : vector<128xf32>
    %49 = vector.multi_reduction <add>, %42, %cst_19 [0] : vector<16x128xf32> to vector<128xf32>
    %50 = vector.shape_cast %49 : vector<128xf32> to vector<1x128xf32>
    %51 = arith.addf %48, %50 : vector<1x128xf32>
    %c1_20 = arith.constant 1 : index
    %c0_21 = arith.constant 0 : index
    %52 = vector.load %arg4[%c1_20, %c0_21] : memref<8x128xf32, #tpu.memory_space<vmem>>, vector<1x128xf32>
    tpu.vector_store %arg4[%c1_20, %c0_21], %51 {strides = array<i32>} : memref<8x128xf32, #tpu.memory_space<vmem>>, vector<1x128xf32>,
    return
  }
  func.func @transform_0(%arg0: i32, %arg1: i32) -> (i32, i32) {
    %c1_i32 = arith.constant 1 : i32
    %0 = arith.muli %arg0, %c1_i32 : i32
    %1 = arith.addi %0, %arg1 : i32
    %c0_i32 = arith.constant 0 : i32
    %c0_i32_0 = arith.constant 0 : i32
    return %1, %c0_i32 : i32, i32
  }
  func.func @transform_1(%arg0: i32, %arg1: i32) -> (i32, i32) {
    %c1_i32 = arith.constant 1 : i32
    %0 = arith.muli %arg0, %c1_i32 : i32
    %1 = arith.addi %0, %arg1 : i32
    %c0_i32 = arith.constant 0 : i32
    %c0_i32_0 = arith.constant 0 : i32
    return %1, %c0_i32 : i32, i32
  }
  func.func @transform_2(%arg0: i32, %arg1: i32) -> (i32, i32) {
    %c0_i32 = arith.constant 0 : i32
    %c0_i32_0 = arith.constant 0 : i32
    return %arg0, %c0_i32 : i32, i32
  }
}

</mosaic_0001>

<bundles_post_ra>
// kernel: gaussian_focal_loss.1
= control target key start
LH: loop header
LB: loop body
LE: loop exit
PB: predicated region body
PF: predicated region fallthrough
CT: control target
= control target key end

     0   :  { %v155_v0 = vmov 0.0   ;;  %s204_s0 = inlined_call_operand.vmem [shape: f32[16,128], index: 0, kind: input, shape index: {}]   ;;  %s205_s1 = inlined_call_operand.vmem [shape: f32[16,128], index: 1, kind: input, shape index: {}]   ;;  %s206_s2 = inlined_call_operand.vmem [shape: f32[8,128], index: 2, kind: output, shape index: {}]  }
   0x1   :  { %59 = vst [vmem:[%s206_s2] sm:$0xff] %v155_v0  ;;  %v60_v1 = vld [vmem:[%s204_s0] sm:$0xff]  ;;  %v61_v2 = vld [vmem:[%s204_s0 + $0x8] sm:$0xff] }
   0x2   :  { %v62_v3 = vld [vmem:[%s205_s1] sm:$0xff]  ;;  %v63_v4 = vld [vmem:[%s205_s1 + $0x8] sm:$0xff]  ;;  %vm68_vm0 = vcmp.eq.f32.partialorder %v60_v1, 0.0  ;;  %vm69_vm1 = vcmp.eq.f32.partialorder %v61_v2, 0.0  ;;  %vm72_vm4 = vcmp.eq.f32.partialorder %v60_v1, 1.0  ;;  %vm73_vm5 = vcmp.eq.f32.partialorder %v61_v2, 1.0 }
   0x3   :  { %vm64_vm2 = vcmp.eq.f32.partialorder %v62_v3, 1.0  ;;  %vm65_vm3 = vcmp.eq.f32.partialorder %v63_v4, 1.0  ;;  %v70_v5 = vsel %vm68_vm0, 1e-07, %v60_v1  ;;  %v71_v6 = vsel %vm69_vm1, 1e-07, %v61_v2 }
   0x4   :  { %v74_v7 = vsel %vm72_vm4, 0.9999999, %v60_v1  ;;  %v75_v8 = vsel %vm73_vm5, 0.9999999, %v61_v2  ;;  %v86_v11 = vsub.f32 1.0, %v62_v3  ;;  %v87_v12 = vsub.f32 1.0, %v63_v4 }
   0x5   :  { %v76_v9 = vsub.f32 1.0, %v74_v7  ;;  %v77_v10 = vsub.f32 1.0, %v75_v8  ;;  %v148_v15 = vsel %vm64_vm2, 1.0, %v155_v0  ;;  %v149_v16 = vsel %vm65_vm3, 1.0, %v155_v0 }
   0x6   :  { %v123_v17 = vadd.f32 %v149_v16, %v148_v15  ;;  %v88_v18 = vmul.f32 %v86_v11, %v86_v11  ;;  %v89_v19 = vmul.f32 %v87_v12, %v87_v12  ;;  %v84_v22 = vsub.f32 1.0, %v70_v5 }
   0x7   :  { %v78_v13 = vsel %vm64_vm2, %v70_v5, %v76_v9  ;;  %v79_v14 = vsel %vm65_vm3, %v71_v6, %v77_v10  ;;  %v92_v23 = vmul.f32 %v74_v7, %v74_v7  ;;  %v85_v25 = vsub.f32 1.0, %v71_v6 }
   0x8   :  { %151 = vlog2.f32 %v78_v13  ;;  %v124_v20 = vrot.slane %v123_v17, 4  ;;  %v94_v24 = vmul.f32 %v88_v18, %v88_v18  ;;  %v93_v26 = vmul.f32 %v75_v8, %v75_v8  ;;  %v122_v35 = vld [vmem:[%s206_s2 + $0x1] sm:$0x1]  ;;  %v112_v54 = vld [vmem:[%s206_s2] sm:$0x1] }
   0x9   :  { %153 = vlog2.f32 %v79_v14  ;;  %v95_v27 = vmul.f32 %v89_v19, %v89_v19  ;;  %v90_v30 = vmul.f32 %v84_v22, %v84_v22  ;;  %v91_v32 = vmul.f32 %v85_v25, %v85_v25 }
   0xa   :  { %v125_v21 = vadd.f32 %v124_v20, %v123_v17  ;;  %v96_v31 = vmul.f32 %v94_v24, %v92_v23  ;;  %vm66_vm6 = vcmp.le.f32.partialorder %v62_v3, 1.0  ;;  %vm67_vm7 = vcmp.le.f32.partialorder %v63_v4, 1.0 }
   0xb   :  { %v97_v33 = vmul.f32 %v95_v27, %v93_v26 }
   0xc   :  { %v126_v28 = vrot.slane %v125_v21, 2  ;;  %v98_v38 = vsel %vm64_vm2, %v90_v30, %v96_v31 }
   0xd   :  { %v99_v41 = vsel %vm65_vm3, %v91_v32, %v97_v33 }
   0xe   :  { %v127_v29 = vadd.f32 %v126_v28, %v125_v21 }
  0x10   :  { %v128_v34 = vrot.slane %v127_v29, 1 }
  0x12   :  { %v129_v36 = vadd.f32 %v128_v34, %v127_v29 }
  0x14   :  { %v130_v42 = vadd.f32 %v129_v36, %v122_v35 }
  0x15   :  { %v152_v37 = vpop.eup %151 }
  0x16   :  { %v154_v39 = vpop.eup %153  ;;  %v81_v40 = vmul.f32 0.6931472, %v152_v37  ;;  %131 = vst [vmem:[%s206_s2 + $0x1] sm:$0x1] %v130_v42 }
  0x17   :  { %v83_v43 = vmul.f32 0.6931472, %v154_v39 }
  0x18   :  { %v100_v44 = vmul.f32 %v98_v38, %v81_v40 }
  0x19   :  { %v101_v45 = vmul.f32 %v99_v41, %v83_v43 }
  0x1a   :  { %v102_v46 = vsel %vm66_vm6, %v100_v44, 0.0 }
  0x1b   :  { %v103_v47 = vsel %vm67_vm7, %v101_v45, 0.0 }
  0x1c   :  { %v113_v48 = vadd.f32 %v103_v47, %v102_v46 }
  0x1e   :  { %v114_v49 = vrot.slane %v113_v48, 4 }
  0x20   :  { %v115_v50 = vadd.f32 %v114_v49, %v113_v48 }
  0x22   :  { %v116_v51 = vrot.slane %v115_v50, 2 }
  0x24   :  { %v117_v52 = vadd.f32 %v116_v51, %v115_v50 }
  0x26   :  { %v118_v53 = vrot.slane %v117_v52, 1 }
  0x28   :  { %v119_v55 = vadd.f32 %v118_v53, %v117_v52 }
  0x2a   :  { %v120_v56 = vadd.f32 %v119_v55, %v112_v54 }
  0x2c   :  { %121 = vst [vmem:[%s206_s2] sm:$0x1] %v120_v56 }

</bundles_post_ra>
